<compile_context>
chip_gen: v7x
topology: tpu7x:2x2x1
jax: 0.10.0
libtpu: 0.0.40
codegen_flags: <defaults>
</compile_context>

<pallas_src>
import functools

import jax
import jax.numpy as jnp
from jax.experimental import pallas as pl
from jax.experimental.pallas import tpu as pltpu

_LANE = 128       # vreg lane width (last dim)
_SUBLANE = 8      # vreg sublane width (second-to-last dim)
_MAX_BATCH_TILE = 512                       # ~85% of HBM roofline; diminishing returns past this
_DEFAULT_VMEM_BUDGET = 40 * 1024 * 1024     # working-set target; safe under v7x's 64 MiB/TC

# Whether this JAX build accepts pl.Buffered(1) (single-buffered resident
# weights). Probed on first use; falls back to default double-buffering.
_single_buffer_ok = True


def _round_up(n, m):
    return ((n + m - 1) // m) * m


def autoencoder_kernel(x_ref, w1t_ref, b1_ref, w2t_ref, b2_ref, o_ref, h_ref):
    """grid = (batch_tiles, decoder_column_tiles).

    The encoder matmul runs once per batch tile (j == 0) and stages the f32
    hidden activation in a VMEM scratch; each j step consumes one (enc_p, tn)
    column slab of W2^T so only a slab needs to be resident in VMEM.
    """
    @pl.when(pl.program_id(1) == 0)
    def _():
        # h = x @ W1^T + b1  (MXU matmul, f32 accumulation; f32 bias add on VPU)
        h_ref[...] = jnp.dot(x_ref[...], w1t_ref[...],
                             preferred_element_type=jnp.float32) + b1_ref[...]

    # y = h @ W2^T + b2 for this output-column slab (f32 accumulation/epilogue).
    y = jnp.dot(h_ref[...].astype(w2t_ref.dtype), w2t_ref[...],
                preferred_element_type=jnp.float32) + b2_ref[...]
    o_ref[...] = y.astype(o_ref.dtype)


@functools.partial(
    jax.jit,
    static_argnames=("compute_dtype", "single_buffer_weights", "vmem_budget_bytes"))
def _forward(x, w1, b1, w2, b2, *, compute_dtype, single_buffer_weights,
             vmem_budget_bytes):
    batch, in_size = x.shape
    enc = w1.shape[0]
    out_size = w2.shape[0]
    out_dtype = x.dtype
    cdt = jnp.dtype(compute_dtype)
    csize = cdt.itemsize
    osize = jnp.dtype(out_dtype).itemsize

    # ---- lane/sublane-dense padded shapes (padding done once, outside the kernel)
    in_p = _round_up(in_size, _LANE)
    enc_p = _round_up(enc, _LANE)
    out_p = _round_up(out_size, _LANE)
    b_pad0 = _round_up(batch, _SUBLANE)

    # ---- decoder column tile: largest 128-multiple divisor of out_p whose
    #      resident weight footprint fits in half the VMEM budget.
    #      (Budgeted conservatively for 2 buffers per operand.)
    def weight_bytes(tn_):
        return (2 * (in_p * enc_p + enc_p * tn_) * csize
                + 2 * (enc_p + tn_) * 4)

    n128 = out_p // _LANE
    tn = _LANE
    for d in range(n128, 0, -1):
        if n128 % d:
            continue
        tn = d * _LANE
        if weight_bytes(tn) <= vmem_budget_bytes // 2:
            break
    # TODO(synk): if in_p*enc_p alone exceeds the budget, add a reduction grid
    # axis over encoder-weight slabs instead of just raising vmem_limit_bytes.

    # ---- batch tile from the remaining budget ----
    per_row_bytes = (2 * in_p * csize       # x tile, double-buffered
                     + 2 * tn * osize       # out tile, double-buffered
                     + enc_p * 4)           # f32 hidden scratch
    remaining = max(vmem_budget_bytes - weight_bytes(tn), vmem_budget_bytes // 4)
    tb = (remaining // per_row_bytes) // _SUBLANE * _SUBLANE
    tb = max(_SUBLANE, min(tb, _MAX_BATCH_TILE, b_pad0))
    if b_pad0 > _SUBLANE:
        # Guarantee >= 2 batch steps so the "parallel" axis feeds both v7x cores.
        tb = min(tb, _round_up(pl.cdiv(b_pad0, 2), _SUBLANE))
    b_pad = _round_up(b_pad0, tb)
    nb = b_pad // tb
    nj = out_p // tn

    # ---- pad + cast operands (zero padding contributes exact zeros) ----
    xp = jnp.zeros((b_pad, in_p), cdt).at[:batch, :in_size].set(x.astype(cdt))
    w1t = jnp.zeros((in_p, enc_p), cdt).at[:in_size, :enc].set(w1.T.astype(cdt))
    w2t = jnp.zeros((enc_p, out_p), cdt).at[:enc, :out_size].set(w2.T.astype(cdt))
    b1p = jnp.zeros((1, enc_p), jnp.float32).at[:, :enc].set(
        b1.reshape(1, -1).astype(jnp.float32))
    b2p = jnp.zeros((1, out_p), jnp.float32).at[:, :out_size].set(
        b2.reshape(1, -1).astype(jnp.float32))

    # ---- explicit VMEM budget for the compiler: footprint + 25% + 2 MiB slack
    footprint = (2 * tb * in_p * csize + 2 * tb * tn * osize      # x / out tiles
                 + 2 * in_p * enc_p * csize + 2 * enc_p * tn * csize   # weights
                 + 2 * (enc_p + tn) * 4                           # biases
                 + tb * enc_p * 4)                                # h scratch
    vmem_limit_bytes = int(max(footprint * 5 // 4 + (2 << 20), 32 << 20))

    flops = 2 * b_pad * (in_p * enc_p + enc_p * out_p)
    bytes_accessed = ((xp.size + w1t.size + w2t.size) * csize
                      + b_pad * out_p * osize + (b1p.size + b2p.size) * 4)

    def resident(shape, index_map, constant):
        # Constant-index operands are never re-fetched; single-buffer them when
        # supported (halves resident weight VMEM).  Varying operands keep the
        # default double buffer so their slab DMA overlaps MXU work.
        if constant and single_buffer_weights:
            return pl.BlockSpec(shape, index_map, pipeline_mode=pl.Buffered(1))
        return pl.BlockSpec(shape, index_map)

    out_padded = pl.pallas_call(
        autoencoder_kernel,
        out_shape=jax.ShapeDtypeStruct((b_pad, out_p), out_dtype),
        grid_spec=pltpu.PrefetchScalarGridSpec(
            num_scalar_prefetch=0,
            grid=(nb, nj),
            in_specs=[
                # x: tiled over batch, double-buffered across batch steps;
                # constant over j so it is not re-fetched per column slab.
                pl.BlockSpec((tb, in_p), lambda i, j: (i, 0)),
                # Encoder weight/bias: fully VMEM-resident (constant index_map).
                resident((in_p, enc_p), lambda i, j: (0, 0), constant=True),
                resident((1, enc_p), lambda i, j: (0, 0), constant=True),
                # Decoder weight/bias: one (enc_p, tn) column slab per j step.
                resident((enc_p, tn), lambda i, j: (0, j), constant=(nj == 1)),
                resident((1, tn), lambda i, j: (0, j), constant=(nj == 1)),
            ],
            out_specs=pl.BlockSpec((tb, tn), lambda i, j: (i, j)),
            scratch_shapes=[pltpu.VMEM((tb, enc_p), jnp.float32)],
        ),
        compiler_params=pltpu.CompilerParams(
            dimension_semantics=("parallel", "arbitrary"),
            vmem_limit_bytes=vmem_limit_bytes,
        ),
        cost_estimate=pl.CostEstimate(
            flops=flops, transcendentals=0, bytes_accessed=bytes_accessed),
    )(xp, w1t, b1p, w2t, b2p)

    # Strip the lane/sublane padding.
    return out_padded[:batch, :out_size]


def autoencoder_forward(x, w1, b1, w2, b2, *, compute_dtype=None,
                        vmem_budget_bytes=_DEFAULT_VMEM_BUDGET):
    """Autoencoder forward: (x @ W1^T + b1) @ W2^T + b2.

    x: (B, in); w1: (enc, in); b1: (enc,); w2: (out, enc); b2: (out,).
    compute_dtype: MXU operand dtype (jnp.bfloat16 gives 2-4x MXU / HBM
    throughput); accumulation + bias epilogue stay f32 and the output keeps
    x.dtype.  Default: x.dtype (bit-for-bit the old behaviour).
    """
    global _single_buffer_ok
    cdt = jnp.dtype(compute_dtype) if compute_dtype is not None else jnp.dtype(x.dtype)
    if _single_buffer_ok:
        try:
            return _forward(x, w1, b1, w2, b2, compute_dtype=cdt,
                            single_buffer_weights=True,
                            vmem_budget_bytes=int(vmem_budget_bytes))
        except Exception:
            # pl.Buffered(1) not supported by this build: fall back to the
            # default double-buffered resident weights (already budgeted for).
            _single_buffer_ok = False
    return _forward(x, w1, b1, w2, b2, compute_dtype=cdt,
                    single_buffer_weights=False,
                    vmem_budget_bytes=int(vmem_budget_bytes))


def init_params(key, input_size, encoding_dim, output_size, dtype=jnp.float32):
    """Deterministic init mirroring nn.Linear shapes (out_features, in_features)."""
    k1, k2, k3, k4 = jax.random.split(key, 4)
    lim1 = 1.0 / (input_size ** 0.5)
    lim2 = 1.0 / (encoding_dim ** 0.5)
    w1 = jax.random.uniform(k1, (encoding_dim, input_size), dtype, -lim1, lim1)
    b1 = jax.random.uniform(k2, (encoding_dim,), dtype, -lim1, lim1)
    w2 = jax.random.uniform(k3, (output_size, encoding_dim), dtype, -lim2, lim2)
    b2 = jax.random.uniform(k4, (output_size,), dtype, -lim2, lim2)
    return w1, b1, w2, b2


if __name__ == "__main__":
    batch = 8
    input_size = 32
    encoding_dim = 16
    output_size = 32

    key = jax.random.PRNGKey(0)
    kx, kp = jax.random.split(key)
    x = jax.random.normal(kx, (batch, input_size), jnp.float32)
    w1, b1, w2, b2 = init_params(kp, input_size, encoding_dim, output_size)

    # Pure-JAX reference (same math as the PyTorch module: two biased Linears).
    ref = (x @ w1.T + b1) @ w2.T + b2

    # f32 path: matches the reference tightly at these shapes.
    out = jax.block_until_ready(autoencoder_forward(x, w1, b1, w2, b2))
    assert out.shape == (batch, output_size)
    assert jnp.allclose(out, ref, atol=1e-5, rtol=1e-5)

    # bf16 MXU-operand path (f32 accumulation / epilogue): looser tolerance.
    out_bf16 = jax.block_until_ready(
        autoencoder_forward(x, w1, b1, w2, b2, compute_dtype=jnp.bfloat16))
    assert out_bf16.shape == (batch, output_size)
    assert jnp.allclose(out_bf16, ref, atol=5e-2, rtol=5e-2)

    # NOTE: at these toy shapes plain XLA is faster (per-call overhead dominates
    # ~40 KFLOP of work); the Pallas path pays off at MXU-scale batch/features.
    print("KERNEL_OK")
</pallas_src>

<mosaic_0001>
module attributes {stable_mosaic.version = 11 : i64} {
  func.func @autoencoder_kernel(%arg0: i32, %arg1: i32, %arg2: memref<8x128xf32, #tpu.memory_space<vmem>>, %arg3: memref<128x128xf32, #tpu.memory_space<vmem>>, %arg4: memref<1x128xf32, #tpu.memory_space<vmem>>, %arg5: memref<128x128xf32, #tpu.memory_space<vmem>>, %arg6: memref<1x128xf32, #tpu.memory_space<vmem>>, %arg7: memref<8x128xf32, #tpu.memory_space<vmem>>, %arg8: memref<8x128xf32, #tpu.memory_space<vmem>>) attributes {dimension_semantics = [#tpu.dimension_semantics<parallel>, #tpu.dimension_semantics<arbitrary>], iteration_bounds = array<i64: 1, 1>, scalar_prefetch = 0 : i64, scratch_operands = 1 : i64, tpu.core_type = #tpu.core_type<tc>, window_params = [{transform_indices = @transform_0, window_bounds = array<i64: 8, 128>}, {pipeline_mode = #tpu.pipeline_mode<synchronous>, transform_indices = @transform_1, window_bounds = array<i64: 128, 128>}, {pipeline_mode = #tpu.pipeline_mode<synchronous>, transform_indices = @transform_2, window_bounds = array<i64: 1, 128>}, {pipeline_mode = #tpu.pipeline_mode<synchronous>, transform_indices = @transform_3, window_bounds = array<i64: 128, 128>}, {pipeline_mode = #tpu.pipeline_mode<synchronous>, transform_indices = @transform_4, window_bounds = array<i64: 1, 128>}, {transform_indices = @transform_5, window_bounds = array<i64: 8, 128>}]} {
    %c0_i32 = arith.constant 0 : i32
    %0 = arith.cmpi eq, %arg1, %c0_i32 : i32
    %1 = arith.extui %0 : i1 to i32
    %c0_i32_0 = arith.constant 0 : i32
    %2 = arith.cmpi ne, %1, %c0_i32_0 : i32
    scf.if %2 {
      %c0_8 = arith.constant 0 : index
      %c0_9 = arith.constant 0 : index
      %10 = vector.load %arg2[%c0_8, %c0_9] : memref<8x128xf32, #tpu.memory_space<vmem>>, vector<8x128xf32>
      %c0_10 = arith.constant 0 : index
      %c0_11 = arith.constant 0 : index
      %11 = vector.load %arg3[%c0_10, %c0_11] : memref<128x128xf32, #tpu.memory_space<vmem>>, vector<128x128xf32>
      %cst_12 = arith.constant dense<0.000000e+00> : vector<8x128xf32>
      %12 = tpu.matmul %10, %11, %cst_12 {dimension_numbers = #tpu.dot_dimension_numbers<[1], [0], [0], [1], [0, 0, 1, 1], [], []>} : vector<8x128xf32>, vector<128x128xf32>, vector<8x128xf32> -> vector<8x128xf32>
      %c0_13 = arith.constant 0 : index
      %c0_14 = arith.constant 0 : index
      %13 = vector.load %arg4[%c0_13, %c0_14] : memref<1x128xf32, #tpu.memory_space<vmem>>, vector<1x128xf32>
      %14 = vector.broadcast %13 : vector<1x128xf32> to vector<8x128xf32>
      %15 = arith.addf %12, %14 : vector<8x128xf32>
      %c0_15 = arith.constant 0 : index
      %c0_16 = arith.constant 0 : index
      %16 = vector.load %arg8[%c0_15, %c0_16] : memref<8x128xf32, #tpu.memory_space<vmem>>, vector<8x128xf32>
      tpu.vector_store %arg8[%c0_15, %c0_16], %15 {strides = array<i32>} : memref<8x128xf32, #tpu.memory_space<vmem>>, vector<8x128xf32>,
    } else {
    }
    %c0 = arith.constant 0 : index
    %c0_1 = arith.constant 0 : index
    %3 = vector.load %arg8[%c0, %c0_1] : memref<8x128xf32, #tpu.memory_space<vmem>>, vector<8x128xf32>
    %c0_2 = arith.constant 0 : index
    %c0_3 = arith.constant 0 : index
    %4 = vector.load %arg5[%c0_2, %c0_3] : memref<128x128xf32, #tpu.memory_space<vmem>>, vector<128x128xf32>
    %cst = arith.constant dense<0.000000e+00> : vector<8x128xf32>
    %5 = tpu.matmul %3, %4, %cst {dimension_numbers = #tpu.dot_dimension_numbers<[1], [0], [0], [1], [0, 0, 1, 1], [], []>} : vector<8x128xf32>, vector<128x128xf32>, vector<8x128xf32> -> vector<8x128xf32>
    %c0_4 = arith.constant 0 : index
    %c0_5 = arith.constant 0 : index
    %6 = vector.load %arg6[%c0_4, %c0_5] : memref<1x128xf32, #tpu.memory_space<vmem>>, vector<1x128xf32>
    %7 = vector.broadcast %6 : vector<1x128xf32> to vector<8x128xf32>
    %8 = arith.addf %5, %7 : vector<8x128xf32>
    %c0_6 = arith.constant 0 : index
    %c0_7 = arith.constant 0 : index
    %9 = vector.load %arg7[%c0_6, %c0_7] : memref<8x128xf32, #tpu.memory_space<vmem>>, vector<8x128xf32>
    tpu.vector_store %arg7[%c0_6, %c0_7], %8 {strides = array<i32>} : memref<8x128xf32, #tpu.memory_space<vmem>>, vector<8x128xf32>,
    return
  }
  func.func @transform_0(%arg0: i32, %arg1: i32) -> (i32, i32) {
    %c0_i32 = arith.constant 0 : i32
    %c0_i32_0 = arith.constant 0 : i32
    return %arg0, %c0_i32 : i32, i32
  }
  func.func @transform_1(%arg0: i32, %arg1: i32) -> (i32, i32) {
    %c0_i32 = arith.constant 0 : i32
    %c0_i32_0 = arith.constant 0 : i32
    %c0_i32_1 = arith.constant 0 : i32
    return %c0_i32, %c0_i32_0 : i32, i32
  }
  func.func @transform_2(%arg0: i32, %arg1: i32) -> (i32, i32) {
    %c0_i32 = arith.constant 0 : i32
    %c0_i32_0 = arith.constant 0 : i32
    %c0_i32_1 = arith.constant 0 : i32
    return %c0_i32, %c0_i32_0 : i32, i32
  }
  func.func @transform_3(%arg0: i32, %arg1: i32) -> (i32, i32) {
    %c0_i32 = arith.constant 0 : i32
    %c0_i32_0 = arith.constant 0 : i32
    return %c0_i32, %arg1 : i32, i32
  }
  func.func @transform_4(%arg0: i32, %arg1: i32) -> (i32, i32) {
    %c0_i32 = arith.constant 0 : i32
    %c0_i32_0 = arith.constant 0 : i32
    return %c0_i32, %arg1 : i32, i32
  }
  func.func @transform_5(%arg0: i32, %arg1: i32) -> (i32, i32) {
    %c0_i32 = arith.constant 0 : i32
    return %arg0, %arg1 : i32, i32
  }
}

module attributes {stable_mosaic.version = 11 : i64} {
  func.func @autoencoder_kernel(%arg0: i32, %arg1: i32, %arg2: memref<8x128xf32, #tpu.memory_space<vmem>>, %arg3: memref<128x128xf32, #tpu.memory_space<vmem>>, %arg4: memref<1x128xf32, #tpu.memory_space<vmem>>, %arg5: memref<128x128xf32, #tpu.memory_space<vmem>>, %arg6: memref<1x128xf32, #tpu.memory_space<vmem>>, %arg7: memref<8x128xf32, #tpu.memory_space<vmem>>, %arg8: memref<8x128xf32, #tpu.memory_space<vmem>>) attributes {dimension_semantics = [#tpu.dimension_semantics<parallel>, #tpu.dimension_semantics<arbitrary>], iteration_bounds = array<i64: 1, 1>, scalar_prefetch = 0 : i64, scratch_operands = 1 : i64, tpu.core_type = #tpu.core_type<tc>, window_params = [{transform_indices = @transform_0, window_bounds = array<i64: 8, 128>}, {pipeline_mode = #tpu.pipeline_mode<synchronous>, transform_indices = @transform_1, window_bounds = array<i64: 128, 128>}, {pipeline_mode = #tpu.pipeline_mode<synchronous>, transform_indices = @transform_2, window_bounds = array<i64: 1, 128>}, {transform_indices = @transform_3, window_bounds = array<i64: 128, 128>}, {transform_indices = @transform_4, window_bounds = array<i64: 1, 128>}, {transform_indices = @transform_5, window_bounds = array<i64: 8, 128>}]} {
    %c0_i32 = arith.constant 0 : i32
    %0 = arith.cmpi eq, %arg1, %c0_i32 : i32
    %1 = arith.extui %0 : i1 to i32
    %c0_i32_0 = arith.constant 0 : i32
    %2 = arith.cmpi ne, %1, %c0_i32_0 : i32
    scf.if %2 {
      %c0_8 = arith.constant 0 : index
      %c0_9 = arith.constant 0 : index
      %10 = vector.load %arg2[%c0_8, %c0_9] : memref<8x128xf32, #tpu.memory_space<vmem>>, vector<8x128xf32>
      %c0_10 = arith.constant 0 : index
      %c0_11 = arith.constant 0 : index
      %11 = vector.load %arg3[%c0_10, %c0_11] : memref<128x128xf32, #tpu.memory_space<vmem>>, vector<128x128xf32>
      %cst_12 = arith.constant dense<0.000000e+00> : vector<8x128xf32>
      %12 = tpu.matmul %10, %11, %cst_12 {dimension_numbers = #tpu.dot_dimension_numbers<[1], [0], [0], [1], [0, 0, 1, 1], [], []>} : vector<8x128xf32>, vector<128x128xf32>, vector<8x128xf32> -> vector<8x128xf32>
      %c0_13 = arith.constant 0 : index
      %c0_14 = arith.constant 0 : index
      %13 = vector.load %arg4[%c0_13, %c0_14] : memref<1x128xf32, #tpu.memory_space<vmem>>, vector<1x128xf32>
      %14 = vector.broadcast %13 : vector<1x128xf32> to vector<8x128xf32>
      %15 = arith.addf %12, %14 : vector<8x128xf32>
      %c0_15 = arith.constant 0 : index
      %c0_16 = arith.constant 0 : index
      %16 = vector.load %arg8[%c0_15, %c0_16] : memref<8x128xf32, #tpu.memory_space<vmem>>, vector<8x128xf32>
      tpu.vector_store %arg8[%c0_15, %c0_16], %15 {strides = array<i32>} : memref<8x128xf32, #tpu.memory_space<vmem>>, vector<8x128xf32>,
    } else {
    }
    %c0 = arith.constant 0 : index
    %c0_1 = arith.constant 0 : index
    %3 = vector.load %arg8[%c0, %c0_1] : memref<8x128xf32, #tpu.memory_space<vmem>>, vector<8x128xf32>
    %c0_2 = arith.constant 0 : index
    %c0_3 = arith.constant 0 : index
    %4 = vector.load %arg5[%c0_2, %c0_3] : memref<128x128xf32, #tpu.memory_space<vmem>>, vector<128x128xf32>
    %cst = arith.constant dense<0.000000e+00> : vector<8x128xf32>
    %5 = tpu.matmul %3, %4, %cst {dimension_numbers = #tpu.dot_dimension_numbers<[1], [0], [0], [1], [0, 0, 1, 1], [], []>} : vector<8x128xf32>, vector<128x128xf32>, vector<8x128xf32> -> vector<8x128xf32>
    %c0_4 = arith.constant 0 : index
    %c0_5 = arith.constant 0 : index
    %6 = vector.load %arg6[%c0_4, %c0_5] : memref<1x128xf32, #tpu.memory_space<vmem>>, vector<1x128xf32>
    %7 = vector.broadcast %6 : vector<1x128xf32> to vector<8x128xf32>
    %8 = arith.addf %5, %7 : vector<8x128xf32>
    %c0_6 = arith.constant 0 : index
    %c0_7 = arith.constant 0 : index
    %9 = vector.load %arg7[%c0_6, %c0_7] : memref<8x128xf32, #tpu.memory_space<vmem>>, vector<8x128xf32>
    tpu.vector_store %arg7[%c0_6, %c0_7], %8 {strides = array<i32>} : memref<8x128xf32, #tpu.memory_space<vmem>>, vector<8x128xf32>,
    return
  }
  func.func @transform_0(%arg0: i32, %arg1: i32) -> (i32, i32) {
    %c0_i32 = arith.constant 0 : i32
    %c0_i32_0 = arith.constant 0 : i32
    return %arg0, %c0_i32 : i32, i32
  }
  func.func @transform_1(%arg0: i32, %arg1: i32) -> (i32, i32) {
    %c0_i32 = arith.constant 0 : i32
    %c0_i32_0 = arith.constant 0 : i32
    %c0_i32_1 = arith.constant 0 : i32
    return %c0_i32, %c0_i32_0 : i32, i32
  }
  func.func @transform_2(%arg0: i32, %arg1: i32) -> (i32, i32) {
    %c0_i32 = arith.constant 0 : i32
    %c0_i32_0 = arith.constant 0 : i32
    %c0_i32_1 = arith.constant 0 : i32
    return %c0_i32, %c0_i32_0 : i32, i32
  }
  func.func @transform_3(%arg0: i32, %arg1: i32) -> (i32, i32) {
    %c0_i32 = arith.constant 0 : i32
    %c0_i32_0 = arith.constant 0 : i32
    return %c0_i32, %arg1 : i32, i32
  }
  func.func @transform_4(%arg0: i32, %arg1: i32) -> (i32, i32) {
    %c0_i32 = arith.constant 0 : i32
    %c0_i32_0 = arith.constant 0 : i32
    return %c0_i32, %arg1 : i32, i32
  }
  func.func @transform_5(%arg0: i32, %arg1: i32) -> (i32, i32) {
    %c0_i32 = arith.constant 0 : i32
    return %arg0, %arg1 : i32, i32
  }
}

</mosaic_0001>

<bundles_post_ra>
// kernel: _forward.1
= control target key start
LH: loop header
LB: loop body
LE: loop exit
PB: predicated region body
PF: predicated region fallthrough
CT: control target
= control target key end

     0   :  { %v411_v3 = vmov 0.0|0.0   ;;  %vm412_vm0 = vmmov 0   ;;  %v413_v6 = vmov 0.0   ;;  %s578_s0 = inlined_call_operand.vmem [shape: f32[8,128], index: 0, kind: input, shape index: {}]   ;;  %s579_s1 = inlined_call_operand.vmem [shape: f32[128,128], index: 1, kind: input, shape index: {}]   ;;  %s580_s2 = inlined_call_operand.vmem [shape: f32[1,128], index: 2, kind: input, shape index: {}]   ;;  %s581_s3 = inlined_call_operand.vmem [shape: f32[128,128], index: 3, kind: input, shape index: {}]   ;;  %s582_s4 = inlined_call_operand.vmem [shape: f32[1,128], index: 4, kind: input, shape index: {}]   ;;  %s583_s5 = inlined_call_operand.hbm [shape: f32[8,128], index: 5, kind: output, shape index: {}]  }
   0x1   :  { %v26_v0 = vld [vmem:[%s579_s1] sm:$0xff]  ;;  %v27_v1 = vld [vmem:[%s579_s1 + $0x8] sm:$0xff]  ;;  %v28_v2 = vld [vmem:[%s579_s1 + $0x10] sm:$0xff]  ;;  %335 = vmatprep.subr.bf16.mxu0 %v411_v3  ;;  %297 = vmatprep.mubr.msk.f32.mxu0 %vm412_vm0, %v413_v6 }
   0x2   :  { %v336_v4 = vpack.c.bf16 %v27_v1, %v26_v0  ;;  %v29_v5 = vld [vmem:[%s579_s1 + $0x18] sm:$0xff]  ;;  %359 = vmatprep.subr.bf16.mxu1 %v411_v3  ;;  %332 = vmatprep.mubr.msk.f32.mxu1 %vm412_vm0, %v413_v6  ;;  %v30_v8 = vld [vmem:[%s579_s1 + $0x20] sm:$0xff]  ;;  %v31_v9 = vld [vmem:[%s579_s1 + $0x28] sm:$0xff] }
   0x3   :  { %v339_v7 = vpack.c.bf16 %v29_v5, %v28_v2  ;;  %v121_v10 = vld [vmem:[%s581_s3] sm:$0xff]  ;;  %v122_v11 = vld [vmem:[%s581_s3 + $0x8] sm:$0xff]  ;;  %v123_v12 = vld [vmem:[%s581_s3 + $0x10] sm:$0xff]  ;;  %v342_v14 = vpack.c.bf16 %v31_v9, %v30_v8 }
   0x4   :  { %337 = vmatpush3.bf16.msra.mxu0 %v336_v4  ;;  %v124_v13 = vld [vmem:[%s581_s3 + $0x18] sm:$0xff]  ;;  %v360_v15 = vpack.c.bf16 %v122_v11, %v121_v10  ;;  %v32_v16 = vld [vmem:[%s579_s1 + $0x30] sm:$0xff]  ;;  %v125_v19 = vld [vmem:[%s581_s3 + $0x20] sm:$0xff] }
   0x5   :  { %338 = vmatprep.subr.bf16.mxu0 %v411_v3  ;;  %v33_v17 = vld [vmem:[%s579_s1 + $0x38] sm:$0xff]  ;;  %v363_v18 = vpack.c.bf16 %v124_v13, %v123_v12  ;;  %v126_v20 = vld [vmem:[%s581_s3 + $0x28] sm:$0xff] }
   0x6   :  { %361 = vmatpush3.bf16.msra.mxu1 %v360_v15 }
   0x7   :  { %362 = vmatprep.subr.bf16.mxu1 %v411_v3 }
   0x8   :  { %340 = vmatpush3.bf16.msra.mxu0 %v339_v7 }
   0x9   :  { %341 = vmatprep.subr.bf16.mxu0 %v411_v3 }
   0xa   :  { %10 = vsyncpa [#allocation4], 0  ;;  %v345_v21 = vpack.c.bf16 %v33_v17, %v32_v16  ;;  %v34_v22 = vld [vmem:[%s579_s1 + $0x40] sm:$0xff]  ;;  %v35_v23 = vld [vmem:[%s579_s1 + $0x48] sm:$0xff]  ;;  %364 = vmatpush3.bf16.msra.mxu1 %v363_v18  ;;  %v366_v24 = vpack.c.bf16 %v126_v20, %v125_v19  ;;  %s414_s11 = smov [#allocation3]  }
   0xb   :  { %365 = vmatprep.subr.bf16.mxu1 %v411_v3  ;;  %v127_v25 = vld [vmem:[%s581_s3 + $0x30] sm:$0xff]  ;;  %v128_v26 = vld [vmem:[%s581_s3 + $0x38] sm:$0xff]  ;;  %v348_v27 = vpack.c.bf16 %v35_v23, %v34_v22  ;;  %v129_v31 = vld [vmem:[%s581_s3 + $0x40] sm:$0xff]  ;;  %s221_s12 = sshll.u32 %s414_s11, 4  ;;  %s222_s12 = int_to_ptr.vmem [resolvable:$true] %s221_s12 }
   0xc   :  { %343 = vmatpush3.bf16.msra.mxu0 %v342_v14  ;;  %v36_v28 = vld [vmem:[%s579_s1 + $0x50] sm:$0xff]  ;;  %v37_v29 = vld [vmem:[%s579_s1 + $0x58] sm:$0xff]  ;;  %v369_v30 = vpack.c.bf16 %v128_v26, %v127_v25  ;;  %v130_v32 = vld [vmem:[%s581_s3 + $0x48] sm:$0xff]  ;;  %p392_p1 = scmp.lt.s32.totalorder %s222_s12, %s222_s12 }
   0xd   :  { %344 = vmatprep.subr.bf16.mxu0 %v411_v3  ;;  %v351_v33 = vpack.c.bf16 %v37_v29, %v36_v28  ;;  %v38_v34 = vld [vmem:[%s579_s1 + $0x60] sm:$0xff]  ;;  %v39_v35 = vld [vmem:[%s579_s1 + $0x68] sm:$0xff]  ;;  %v372_v36 = vpack.c.bf16 %v130_v32, %v129_v31  ;;  %v131_v37 = vld [vmem:[%s581_s3 + $0x50] sm:$0xff] }
   0xe   :  { %367 = vmatpush3.bf16.msra.mxu1 %v366_v24  ;;  %v132_v38 = vld [vmem:[%s581_s3 + $0x58] sm:$0xff]  ;;  %v354_v39 = vpack.c.bf16 %v39_v35, %v38_v34  ;;  %v40_v40 = vld [vmem:[%s579_s1 + $0x70] sm:$0xff]  ;;  %v133_v43 = vld [vmem:[%s581_s3 + $0x60] sm:$0xff] }
   0xf   :  { %368 = vmatprep.subr.bf16.mxu1 %v411_v3  ;;  %v41_v41 = vld [vmem:[%s579_s1 + $0x78] sm:$0xff]  ;;  %v375_v42 = vpack.c.bf16 %v132_v38, %v131_v37  ;;  %v134_v44 = vld [vmem:[%s581_s3 + $0x68] sm:$0xff]  ;;  %v25_v47 = vld [vmem:[%s578_s0] sm:$0xff] }
  0x10   :  { %346 = vmatpush3.bf16.msra.mxu0 %v345_v21  ;;  %v357_v45 = vpack.c.bf16 %v41_v41, %v40_v40  ;;  %v378_v46 = vpack.c.bf16 %v134_v44, %v133_v43  ;;  %v135_v48 = vld [vmem:[%s581_s3 + $0x70] sm:$0xff]  ;;  %v136_v49 = vld [vmem:[%s581_s3 + $0x78] sm:$0xff]  ;;  %v229_v51 = vld [vmem:[%s580_s2] ss:$0 sm:$0xff]  ;;  %s387_s3 = scalar_lea.vmem %s222_s12, 128 }
  0x11   :  { %347 = vmatprep.subr.bf16.mxu0 %v411_v3  ;;  %v381_v50 = vpack.c.bf16 %v136_v49, %v135_v48  ;;  %v230_v55 = vld [vmem:[%s582_s4] ss:$0 sm:$0xff]  ;;  %p388_p0 = scmp.ne.s32.totalorder %s222_s12, %s387_s3  ;;  %p393_p2 = scmp.lt.s32.totalorder %s387_s3, %s387_s3 }
  0x12   :  { %370 = vmatpush3.bf16.msra.mxu1 %v369_v30 }
  0x13   :  { %371 = vmatprep.subr.bf16.mxu1 %v411_v3  ;;  %p394_p3 = por %p393_p2, %p392_p1 }
  0x14   :  { %349 = vmatpush3.bf16.msra.mxu0 %v348_v27 }
  0x15   :  { %350 = vmatprep.subr.bf16.mxu0 %v411_v3  ;;  %p395_p4 = pnand %p394_p3, %p388_p0 }
  0x16   :  { %373 = vmatpush3.bf16.msra.mxu1 %v372_v36 }
  0x17   :  { %374 = vmatprep.subr.bf16.mxu1 %v411_v3 }
  0x18   :  { %352 = vmatpush3.bf16.msra.mxu0 %v351_v33 }
  0x19   :  { %353 = vmatprep.subr.bf16.mxu0 %v411_v3 }
  0x1a   :  { %376 = vmatpush3.bf16.msra.mxu1 %v375_v42 }
  0x1b   :  { %377 = vmatprep.subr.bf16.mxu1 %v411_v3 }
  0x1c   :  { %355 = vmatpush3.bf16.msra.mxu0 %v354_v39 }
  0x1d   :  { %356 = vmatprep.subr.bf16.mxu0 %v411_v3 }
  0x1e   :  { %379 = vmatpush3.bf16.msra.mxu1 %v378_v46 }
  0x1f   :  { %380 = vmatprep.subr.bf16.mxu1 %v411_v3 }
  0x20   :  { %358 = vmatpush3.bf16.msra.mxu0 %v357_v45 }
  0x22   :  { %382 = vmatpush3.bf16.msra.mxu1 %v381_v50 }
  0x23   :  { %298 = vmatmul.mubr.f32.vlgmr.msra.gmra.mrb[0].mxu0 %v25_v47 }
  0xf6   :  { %v115_v52 = vpop.f32.mrb[0].mxu0 }
  0xf7   :  { %v116_v53 = vadd.f32 %v229_v51, %v115_v52  ;;  %v299_v54 = vpop.f32.mrb[1].mxu0 }
  0xf9   :  { %333 = vmatmul.mubr.f32.vlgmr.msra.gmra.mrb[0].mxu1 %v116_v53 }
 0x1cc   :  { %v210_v56 = vpop.f32.mrb[0].mxu1 }
 0x1cd   :  { %v211_v57 = vadd.f32 %v230_v55, %v210_v56  ;;  %v334_v58 = vpop.f32.mrb[1].mxu1 }
 0x1cf   :  { %214 = vst [vmem:[#allocation3] sm:$0xff] %v211_v57 }
 0x1d0   :  { %398 = shalt.err (!%p395_p4)
}
 0x1d1   :  { %s399_s14 = scalar_lea.hbm %s583_s5, 128 }
 0x1d2   :  { %p400_p5 = scmp.ne.s32.totalorder %s583_s5, %s399_s14  ;;  %p403_p6 = scmp.lt.u32.totalorder %s399_s14, %s583_s5 }
 0x1d4   :  { %p405_p7 = pnand %p403_p6, %p400_p5 }
 0x1d6   :  { %408 = shalt.err (!%p405_p7)
}
 0x1d7   :  { %224 = dma.vmem_to_hbm [thread:$0]  %s222_s12, 128, %s583_s5, [#allocation4]  }
 0x1d8   :  { %409 = dma.done.wait [#allocation4], 128  }
 0x1d9   :  { %410 = vsyncadd [#allocation4], 4294967168 }
 0x1da   :  { %228 = vsyncpa [#allocation4], 1 }

// kernel: _forward.1
= control target key start
LH: loop header
LB: loop body
LE: loop exit
PB: predicated region body
PF: predicated region fallthrough
CT: control target
= control target key end

     0   :  { %v411_v3 = vmov 0.0|0.0   ;;  %vm412_vm0 = vmmov 0   ;;  %v413_v6 = vmov 0.0   ;;  %s578_s0 = inlined_call_operand.vmem [shape: f32[8,128], index: 0, kind: input, shape index: {}]   ;;  %s579_s1 = inlined_call_operand.vmem [shape: f32[128,128], index: 1, kind: input, shape index: {}]   ;;  %s580_s2 = inlined_call_operand.vmem [shape: f32[1,128], index: 2, kind: input, shape index: {}]   ;;  %s581_s3 = inlined_call_operand.vmem [shape: f32[128,128], index: 3, kind: input, shape index: {}]   ;;  %s582_s4 = inlined_call_operand.vmem [shape: f32[1,128], index: 4, kind: input, shape index: {}]   ;;  %s583_s5 = inlined_call_operand.hbm [shape: f32[8,128], index: 5, kind: output, shape index: {}]  }
   0x1   :  { %v26_v0 = vld [vmem:[%s579_s1] sm:$0xff]  ;;  %v27_v1 = vld [vmem:[%s579_s1 + $0x8] sm:$0xff]  ;;  %v28_v2 = vld [vmem:[%s579_s1 + $0x10] sm:$0xff]  ;;  %335 = vmatprep.subr.bf16.mxu0 %v411_v3  ;;  %297 = vmatprep.mubr.msk.f32.mxu0 %vm412_vm0, %v413_v6 }
   0x2   :  { %v336_v4 = vpack.c.bf16 %v27_v1, %v26_v0  ;;  %v29_v5 = vld [vmem:[%s579_s1 + $0x18] sm:$0xff]  ;;  %359 = vmatprep.subr.bf16.mxu1 %v411_v3  ;;  %332 = vmatprep.mubr.msk.f32.mxu1 %vm412_vm0, %v413_v6  ;;  %v30_v8 = vld [vmem:[%s579_s1 + $0x20] sm:$0xff]  ;;  %v31_v9 = vld [vmem:[%s579_s1 + $0x28] sm:$0xff] }
   0x3   :  { %v339_v7 = vpack.c.bf16 %v29_v5, %v28_v2  ;;  %v121_v10 = vld [vmem:[%s581_s3] sm:$0xff]  ;;  %v122_v11 = vld [vmem:[%s581_s3 + $0x8] sm:$0xff]  ;;  %v123_v12 = vld [vmem:[%s581_s3 + $0x10] sm:$0xff]  ;;  %v342_v14 = vpack.c.bf16 %v31_v9, %v30_v8 }
   0x4   :  { %337 = vmatpush3.bf16.msra.mxu0 %v336_v4  ;;  %v124_v13 = vld [vmem:[%s581_s3 + $0x18] sm:$0xff]  ;;  %v360_v15 = vpack.c.bf16 %v122_v11, %v121_v10  ;;  %v32_v16 = vld [vmem:[%s579_s1 + $0x30] sm:$0xff]  ;;  %v125_v19 = vld [vmem:[%s581_s3 + $0x20] sm:$0xff] }
   0x5   :  { %338 = vmatprep.subr.bf16.mxu0 %v411_v3  ;;  %v33_v17 = vld [vmem:[%s579_s1 + $0x38] sm:$0xff]  ;;  %v363_v18 = vpack.c.bf16 %v124_v13, %v123_v12  ;;  %v126_v20 = vld [vmem:[%s581_s3 + $0x28] sm:$0xff] }
   0x6   :  { %361 = vmatpush3.bf16.msra.mxu1 %v360_v15 }
   0x7   :  { %362 = vmatprep.subr.bf16.mxu1 %v411_v3 }
   0x8   :  { %340 = vmatpush3.bf16.msra.mxu0 %v339_v7 }
   0x9   :  { %341 = vmatprep.subr.bf16.mxu0 %v411_v3 }
   0xa   :  { %10 = vsyncpa [#allocation4], 0  ;;  %v345_v21 = vpack.c.bf16 %v33_v17, %v32_v16  ;;  %v34_v22 = vld [vmem:[%s579_s1 + $0x40] sm:$0xff]  ;;  %v35_v23 = vld [vmem:[%s579_s1 + $0x48] sm:$0xff]  ;;  %364 = vmatpush3.bf16.msra.mxu1 %v363_v18  ;;  %v366_v24 = vpack.c.bf16 %v126_v20, %v125_v19  ;;  %s414_s11 = smov [#allocation3]  }
   0xb   :  { %365 = vmatprep.subr.bf16.mxu1 %v411_v3  ;;  %v127_v25 = vld [vmem:[%s581_s3 + $0x30] sm:$0xff]  ;;  %v128_v26 = vld [vmem:[%s581_s3 + $0x38] sm:$0xff]  ;;  %v348_v27 = vpack.c.bf16 %v35_v23, %v34_v22  ;;  %v129_v31 = vld [vmem:[%s581_s3 + $0x40] sm:$0xff]  ;;  %s221_s12 = sshll.u32 %s414_s11, 4  ;;  %s222_s12 = int_to_ptr.vmem [resolvable:$true] %s221_s12 }
   0xc   :  { %343 = vmatpush3.bf16.msra.mxu0 %v342_v14  ;;  %v36_v28 = vld [vmem:[%s579_s1 + $0x50] sm:$0xff]  ;;  %v37_v29 = vld [vmem:[%s579_s1 + $0x58] sm:$0xff]  ;;  %v369_v30 = vpack.c.bf16 %v128_v26, %v127_v25  ;;  %v130_v32 = vld [vmem:[%s581_s3 + $0x48] sm:$0xff]  ;;  %p392_p1 = scmp.lt.s32.totalorder %s222_s12, %s222_s12 }
   0xd   :  { %344 = vmatprep.subr.bf16.mxu0 %v411_v3  ;;  %v351_v33 = vpack.c.bf16 %v37_v29, %v36_v28  ;;  %v38_v34 = vld [vmem:[%s579_s1 + $0x60] sm:$0xff]  ;;  %v39_v35 = vld [vmem:[%s579_s1 + $0x68] sm:$0xff]  ;;  %v372_v36 = vpack.c.bf16 %v130_v32, %v129_v31  ;;  %v131_v37 = vld [vmem:[%s581_s3 + $0x50] sm:$0xff] }
   0xe   :  { %367 = vmatpush3.bf16.msra.mxu1 %v366_v24  ;;  %v132_v38 = vld [vmem:[%s581_s3 + $0x58] sm:$0xff]  ;;  %v354_v39 = vpack.c.bf16 %v39_v35, %v38_v34  ;;  %v40_v40 = vld [vmem:[%s579_s1 + $0x70] sm:$0xff]  ;;  %v133_v43 = vld [vmem:[%s581_s3 + $0x60] sm:$0xff] }
   0xf   :  { %368 = vmatprep.subr.bf16.mxu1 %v411_v3  ;;  %v41_v41 = vld [vmem:[%s579_s1 + $0x78] sm:$0xff]  ;;  %v375_v42 = vpack.c.bf16 %v132_v38, %v131_v37  ;;  %v134_v44 = vld [vmem:[%s581_s3 + $0x68] sm:$0xff]  ;;  %v25_v47 = vld [vmem:[%s578_s0] sm:$0xff] }
  0x10   :  { %346 = vmatpush3.bf16.msra.mxu0 %v345_v21  ;;  %v357_v45 = vpack.c.bf16 %v41_v41, %v40_v40  ;;  %v378_v46 = vpack.c.bf16 %v134_v44, %v133_v43  ;;  %v135_v48 = vld [vmem:[%s581_s3 + $0x70] sm:$0xff]  ;;  %v136_v49 = vld [vmem:[%s581_s3 + $0x78] sm:$0xff]  ;;  %v229_v51 = vld [vmem:[%s580_s2] ss:$0 sm:$0xff]  ;;  %s387_s3 = scalar_lea.vmem %s222_s12, 128 }
  0x11   :  { %347 = vmatprep.subr.bf16.mxu0 %v411_v3  ;;  %v381_v50 = vpack.c.bf16 %v136_v49, %v135_v48  ;;  %v230_v55 = vld [vmem:[%s582_s4] ss:$0 sm:$0xff]  ;;  %p388_p0 = scmp.ne.s32.totalorder %s222_s12, %s387_s3  ;;  %p393_p2 = scmp.lt.s32.totalorder %s387_s3, %s387_s3 }
  0x12   :  { %370 = vmatpush3.bf16.msra.mxu1 %v369_v30 }
  0x13   :  { %371 = vmatprep.subr.bf16.mxu1 %v411_v3  ;;  %p394_p3 = por %p393_p2, %p392_p1 }
  0x14   :  { %349 = vmatpush3.bf16.msra.mxu0 %v348_v27 }
  0x15   :  { %350 = vmatprep.subr.bf16.mxu0 %v411_v3  ;;  %p395_p4 = pnand %p394_p3, %p388_p0 }
  0x16   :  { %373 = vmatpush3.bf16.msra.mxu1 %v372_v36 }
  0x17   :  { %374 = vmatprep.subr.bf16.mxu1 %v411_v3 }
  0x18   :  { %352 = vmatpush3.bf16.msra.mxu0 %v351_v33 }
  0x19   :  { %353 = vmatprep.subr.bf16.mxu0 %v411_v3 }
  0x1a   :  { %376 = vmatpush3.bf16.msra.mxu1 %v375_v42 }
  0x1b   :  { %377 = vmatprep.subr.bf16.mxu1 %v411_v3 }
  0x1c   :  { %355 = vmatpush3.bf16.msra.mxu0 %v354_v39 }
  0x1d   :  { %356 = vmatprep.subr.bf16.mxu0 %v411_v3 }
  0x1e   :  { %379 = vmatpush3.bf16.msra.mxu1 %v378_v46 }
  0x1f   :  { %380 = vmatprep.subr.bf16.mxu1 %v411_v3 }
  0x20   :  { %358 = vmatpush3.bf16.msra.mxu0 %v357_v45 }
  0x22   :  { %382 = vmatpush3.bf16.msra.mxu1 %v381_v50 }
  0x23   :  { %298 = vmatmul.mubr.f32.vlgmr.msra.gmra.mrb[0].mxu0 %v25_v47 }
  0xf6   :  { %v115_v52 = vpop.f32.mrb[0].mxu0 }
  0xf7   :  { %v116_v53 = vadd.f32 %v229_v51, %v115_v52  ;;  %v299_v54 = vpop.f32.mrb[1].mxu0 }
  0xf9   :  { %333 = vmatmul.mubr.f32.vlgmr.msra.gmra.mrb[0].mxu1 %v116_v53 }
 0x1cc   :  { %v210_v56 = vpop.f32.mrb[0].mxu1 }
 0x1cd   :  { %v211_v57 = vadd.f32 %v230_v55, %v210_v56  ;;  %v334_v58 = vpop.f32.mrb[1].mxu1 }
 0x1cf   :  { %214 = vst [vmem:[#allocation3] sm:$0xff] %v211_v57 }
 0x1d0   :  { %398 = shalt.err (!%p395_p4)
}
 0x1d1   :  { %s399_s14 = scalar_lea.hbm %s583_s5, 128 }
 0x1d2   :  { %p400_p5 = scmp.ne.s32.totalorder %s583_s5, %s399_s14  ;;  %p403_p6 = scmp.lt.u32.totalorder %s399_s14, %s583_s5 }
 0x1d4   :  { %p405_p7 = pnand %p403_p6, %p400_p5 }
 0x1d6   :  { %408 = shalt.err (!%p405_p7)
}
 0x1d7   :  { %224 = dma.vmem_to_hbm [thread:$0]  %s222_s12, 128, %s583_s5, [#allocation4]  }
 0x1d8   :  { %409 = dma.done.wait [#allocation4], 128  }
 0x1d9   :  { %410 = vsyncadd [#allocation4], 4294967168 }
 0x1da   :  { %228 = vsyncpa [#allocation4], 1 }

</bundles_post_ra>
